<compile_context>
chip_gen: v7x
topology: tpu7x:2x2x1
jax: 0.10.0
libtpu: 0.0.40
codegen_flags: <defaults>
</compile_context>

<pallas_src>
import jax
import jax.numpy as jnp
from jax.experimental import pallas as pl
from jax.experimental.pallas import tpu as pltpu


def attention_block_kernel(g_ref, x_ref, wg_ref, wx_ref, b_ref,
                           wpsi_ref, bpsi_ref, out_ref):
    g = g_ref[...]                                   # (F_l, TM)  spatial on lanes
    x = x_ref[...]                                   # (F_g, TM)

    # W_g (two folded 1x1 convs) and W_x, with both biases pre-summed.
    a = jnp.dot(wg_ref[...], g, preferred_element_type=jnp.float32)
    a = a + jnp.dot(wx_ref[...], x, preferred_element_type=jnp.float32)
    a = jnp.maximum(a + b_ref[...], 0.0)             # relu(g1 + x1)  (F_int, TM)

    # psi: Conv1x1(F_int->1) (+ folded BN) as VPU MAC + sublane reduce, sigmoid.
    p = jnp.sum(wpsi_ref[...] * a, axis=0, keepdims=True) + bpsi_ref[0, 0]
    p = jax.nn.sigmoid(p)                            # (1, TM)

    # out = x * psi   (psi broadcast over the F_g channel sublanes).
    out_ref[...] = (x * p).astype(out_ref.dtype)


def _pick_spatial_tile(hw, tm_max=1024):
    """Largest multiple-of-128 divisor of hw that is <= tm_max, else full row."""
    if hw <= tm_max or hw % 128 != 0:
        return hw
    t = (tm_max // 128) * 128
    while t >= 128:
        if hw % t == 0:
            return t
        t -= 128
    return hw


def attention_block(g_nchw, x_nchw, params, *, tm=None):
    """g_nchw: (N, F_l, H, W), x_nchw: (N, F_g, H, W) -> (N, F_g, H, W)."""
    N, F_l, H, W = g_nchw.shape
    _, F_g, _, _ = x_nchw.shape
    wg1, bg1, wg2, bg2, wx1, bx1, wpsi, bpsi = params
    F_int = wg2.shape[1]
    HW = H * W

    if tm is None:
        # Large spatial tiles amortize the ~0.35 us per-grid-step overhead; with
        # <=16 f32 channels a (C, 1024) tile is only tens of KiB, well inside the
        # scoped VMEM budget on v5e/v6e (32/128 MiB) and v7x (32/64 MiB), so no
        # explicit vmem_limit_bytes is needed.
        tm = _pick_spatial_tile(HW)
    assert HW % tm == 0, "spatial tile must divide H*W"

    # Trace-time parameter folding (tiny matmuls, plain JAX):
    #   (g @ wg1 + bg1) @ wg2 + bg2 == g @ (wg1 @ wg2) + (bg1 @ wg2 + bg2)
    # and the W_g / W_x biases are added exactly once before the shared relu.
    wg_t = (wg1 @ wg2).T.astype(jnp.float32)                    # (F_int, F_l)
    wx_t = wx1.T.astype(jnp.float32)                            # (F_int, F_g)
    b_sum = ((bg1 @ wg2 + bg2) + bx1).T.astype(jnp.float32)     # (F_int, 1)
    # wpsi is already (F_int, 1); bpsi (1, 1) is passed via SMEM as a scalar.

    g3 = g_nchw.reshape(N, F_l, HW)    # free reshapes, no transpose through HBM
    x3 = x_nchw.reshape(N, F_g, HW)

    rep = lambda n, s: (0, 0)          # weights/biases: one block, replicated
    out3 = pl.pallas_call(
        attention_block_kernel,
        out_shape=jax.ShapeDtypeStruct((N, F_g, HW), x_nchw.dtype),
        grid_spec=pltpu.PrefetchScalarGridSpec(
            num_scalar_prefetch=0,
            grid=(N, HW // tm),
            in_specs=[
                pl.BlockSpec((pl.Squeezed(), F_l, tm), lambda n, s: (n, 0, s)),
                pl.BlockSpec((pl.Squeezed(), F_g, tm), lambda n, s: (n, 0, s)),
                pl.BlockSpec((F_int, F_l), rep),
                pl.BlockSpec((F_int, F_g), rep),
                pl.BlockSpec((F_int, 1), rep),
                pl.BlockSpec((F_int, 1), rep),
                pl.BlockSpec(memory_space=pltpu.MemorySpace.SMEM),
            ],
            out_specs=pl.BlockSpec((pl.Squeezed(), F_g, tm),
                                   lambda n, s: (n, 0, s)),
        ),
        compiler_params=pltpu.CompilerParams(
            # Both grid axes are independent -> megacore-shardable; the batch
            # axis keeps >=2 parallel steps so both v7x TensorCores get work.
            dimension_semantics=("parallel", "parallel")),
    )(g3, x3, wg_t, wx_t, b_sum, wpsi, bpsi)

    return out3.reshape(N, F_g, H, W)


def _fold_bn(w, b, gamma, beta, mean, var, eps=1e-5):
    """Fold eval-mode BatchNorm into the preceding 1x1 conv (w: (Cin,Cout), b: (1,Cout))."""
    s = gamma / jnp.sqrt(var + eps)
    return w * s[None, :], b * s[None, :] + (beta - mean * s)[None, :]


def make_params(key, F_g, F_l, F_int):
    ks = jax.random.split(key, 16)
    f32 = jnp.float32
    # Conv weights stored as (C_in, C_out); biases as (1, C_out).
    wg1 = 0.1 * jax.random.normal(ks[0], (F_l, F_g), f32)
    bg1 = 0.1 * jax.random.normal(ks[1], (1, F_g), f32)
    wg2 = 0.1 * jax.random.normal(ks[2], (F_g, F_int), f32)
    bg2 = 0.1 * jax.random.normal(ks[3], (1, F_int), f32)
    wx1 = 0.1 * jax.random.normal(ks[4], (F_g, F_int), f32)
    bx1 = 0.1 * jax.random.normal(ks[5], (1, F_int), f32)
    wps = 0.1 * jax.random.normal(ks[6], (F_int, 1), f32)
    bps = 0.1 * jax.random.normal(ks[7], (1, 1), f32)

    def bn_params(k, c):
        k1, k2, k3, k4 = jax.random.split(k, 4)
        gamma = jax.random.uniform(k1, (c,), f32, 0.5, 1.5)
        beta = 0.1 * jax.random.normal(k2, (c,), f32)
        mean = 0.1 * jax.random.normal(k3, (c,), f32)
        var = jax.random.uniform(k4, (c,), f32, 0.5, 1.5)
        return gamma, beta, mean, var

    wg2, bg2 = _fold_bn(wg2, bg2, *bn_params(ks[8], F_int))   # BN after W_g's 2nd conv
    wx1, bx1 = _fold_bn(wx1, bx1, *bn_params(ks[9], F_int))   # BN in W_x
    wps, bps = _fold_bn(wps, bps, *bn_params(ks[10], 1))      # BN in psi
    return (wg1, bg1, wg2, bg2, wx1, bx1, wps, bps)


def reference(g_nchw, x_nchw, params):
    """Plain-JAX reference following the PyTorch module's (unfused) op order."""
    wg1, bg1, wg2, bg2, wx1, bx1, wpsi, bpsi = params
    g = jnp.transpose(g_nchw, (0, 2, 3, 1))
    x = jnp.transpose(x_nchw, (0, 2, 3, 1))
    g1 = (g @ wg1 + bg1) @ wg2 + bg2
    x1 = x @ wx1 + bx1
    a = jnp.maximum(g1 + x1, 0.0)
    p = jax.nn.sigmoid(a @ wpsi + bpsi)
    return jnp.transpose(x * p, (0, 3, 1, 2))


if __name__ == "__main__":
    # Module instantiated as Attention_block(F_g=8, F_l=4, F_int=16):
    #   g has F_l channels, x has F_g channels (per the module's conv in_channels).
    N, H, W = 2, 16, 16
    F_g, F_l, F_int = 8, 4, 16

    key = jax.random.PRNGKey(0)
    kg, kx, kp = jax.random.split(key, 3)
    g = jax.random.normal(kg, (N, F_l, H, W), jnp.float32)
    x = jax.random.normal(kx, (N, F_g, H, W), jnp.float32)
    params = make_params(kp, F_g, F_l, F_int)

    out = attention_block(g, x, params)
    out = jax.block_until_ready(out)

    ref = reference(g, x, params)
    assert out.shape == (N, F_g, H, W)
    assert jnp.allclose(out, ref, atol=1e-5, rtol=1e-4), "mismatch vs JAX reference"
    print("KERNEL_OK")
</pallas_src>

<mosaic_0001>
module attributes {stable_mosaic.version = 11 : i64} {
  func.func @attention_block_kernel(%arg0: i32, %arg1: i32, %arg2: memref<1x4x256xf32, #tpu.memory_space<vmem>>, %arg3: memref<1x8x256xf32, #tpu.memory_space<vmem>>, %arg4: memref<16x4xf32, #tpu.memory_space<vmem>>, %arg5: memref<16x8xf32, #tpu.memory_space<vmem>>, %arg6: memref<16x1xf32, #tpu.memory_space<vmem>>, %arg7: memref<16x1xf32, #tpu.memory_space<vmem>>, %arg8: memref<1x1xf32, #tpu.memory_space<smem>>, %arg9: memref<1x8x256xf32, #tpu.memory_space<vmem>>) attributes {dimension_semantics = [#tpu.dimension_semantics<parallel>, #tpu.dimension_semantics<parallel>], iteration_bounds = array<i64: 2, 1>, scalar_prefetch = 0 : i64, scratch_operands = 0 : i64, tpu.core_type = #tpu.core_type<tc>, window_params = [{transform_indices = @transform_0, window_bounds = array<i64: 1, 4, 256>}, {transform_indices = @transform_1, window_bounds = array<i64: 1, 8, 256>}, {pipeline_mode = #tpu.pipeline_mode<synchronous>, transform_indices = @transform_2, window_bounds = array<i64: 16, 4>}, {pipeline_mode = #tpu.pipeline_mode<synchronous>, transform_indices = @transform_3, window_bounds = array<i64: 16, 8>}, {pipeline_mode = #tpu.pipeline_mode<synchronous>, transform_indices = @transform_4, window_bounds = array<i64: 16, 1>}, {pipeline_mode = #tpu.pipeline_mode<synchronous>, transform_indices = @transform_5, window_bounds = array<i64: 16, 1>}, {transform_indices = @transform_6, window_bounds = array<i64: 1, 1>}, {transform_indices = @transform_7, window_bounds = array<i64: 1, 8, 256>}]} {
    %c0 = arith.constant 0 : index
    %c0_0 = arith.constant 0 : index
    %c0_1 = arith.constant 0 : index
    %0 = vector.load %arg2[%c0, %c0_0, %c0_1] : memref<1x4x256xf32, #tpu.memory_space<vmem>>, vector<1x4x256xf32>
    %1 = vector.shape_cast %0 : vector<1x4x256xf32> to vector<4x256xf32>
    %c0_2 = arith.constant 0 : index
    %c0_3 = arith.constant 0 : index
    %c0_4 = arith.constant 0 : index
    %2 = vector.load %arg3[%c0_2, %c0_3, %c0_4] : memref<1x8x256xf32, #tpu.memory_space<vmem>>, vector<1x8x256xf32>
    %3 = vector.shape_cast %2 : vector<1x8x256xf32> to vector<8x256xf32>
    %c0_5 = arith.constant 0 : index
    %c0_6 = arith.constant 0 : index
    %4 = vector.load %arg4[%c0_5, %c0_6] : memref<16x4xf32, #tpu.memory_space<vmem>>, vector<16x4xf32>
    %cst = arith.constant dense<0.000000e+00> : vector<16x256xf32>
    %5 = tpu.matmul %4, %1, %cst {dimension_numbers = #tpu.dot_dimension_numbers<[1], [0], [0], [1], [0, 0, 1, 1], [], []>} : vector<16x4xf32>, vector<4x256xf32>, vector<16x256xf32> -> vector<16x256xf32>
    %c0_7 = arith.constant 0 : index
    %c0_8 = arith.constant 0 : index
    %6 = vector.load %arg5[%c0_7, %c0_8] : memref<16x8xf32, #tpu.memory_space<vmem>>, vector<16x8xf32>
    %cst_9 = arith.constant dense<0.000000e+00> : vector<16x256xf32>
    %7 = tpu.matmul %6, %3, %cst_9 {dimension_numbers = #tpu.dot_dimension_numbers<[1], [0], [0], [1], [0, 0, 1, 1], [], []>} : vector<16x8xf32>, vector<8x256xf32>, vector<16x256xf32> -> vector<16x256xf32>
    %8 = arith.addf %5, %7 : vector<16x256xf32>
    %c0_10 = arith.constant 0 : index
    %c0_11 = arith.constant 0 : index
    %9 = vector.load %arg6[%c0_10, %c0_11] : memref<16x1xf32, #tpu.memory_space<vmem>>, vector<16x1xf32>
    %10 = vector.broadcast %9 : vector<16x1xf32> to vector<16x256xf32>
    %11 = arith.addf %8, %10 : vector<16x256xf32>
    %cst_12 = arith.constant 0.000000e+00 : f32
    %12 = vector.broadcast %cst_12 : f32 to vector<16x256xf32>
    %13 = arith.maximumf %11, %12 : vector<16x256xf32>
    %c0_13 = arith.constant 0 : index
    %c0_14 = arith.constant 0 : index
    %14 = vector.load %arg7[%c0_13, %c0_14] : memref<16x1xf32, #tpu.memory_space<vmem>>, vector<16x1xf32>
    %15 = vector.broadcast %14 : vector<16x1xf32> to vector<16x256xf32>
    %16 = arith.mulf %15, %13 : vector<16x256xf32>
    %cst_15 = arith.constant dense<0.000000e+00> : vector<256xf32>
    %17 = vector.multi_reduction <add>, %16, %cst_15 [0] : vector<16x256xf32> to vector<256xf32>
    %18 = vector.shape_cast %17 : vector<256xf32> to vector<1x256xf32>
    %c0_16 = arith.constant 0 : index
    %c0_17 = arith.constant 0 : index
    %19 = memref.load %arg8[%c0_16, %c0_17] : memref<1x1xf32, #tpu.memory_space<smem>>
    %20 = vector.broadcast %19 : f32 to vector<1x256xf32>
    %21 = arith.addf %18, %20 : vector<1x256xf32>
    %22 = arith.negf %21 : vector<1x256xf32>
    %23 = math.exp %22 : vector<1x256xf32>
    %cst_18 = arith.constant 1.000000e+00 : f32
    %24 = vector.broadcast %cst_18 : f32 to vector<1x256xf32>
    %25 = arith.addf %24, %23 : vector<1x256xf32>
    %26 = arith.divf %24, %25 : vector<1x256xf32>
    %27 = vector.broadcast %26 : vector<1x256xf32> to vector<8x256xf32>
    %28 = arith.mulf %3, %27 : vector<8x256xf32>
    %c0_19 = arith.constant 0 : index
    %c0_20 = arith.constant 0 : index
    %c0_21 = arith.constant 0 : index
    %29 = vector.load %arg9[%c0_19, %c0_20, %c0_21] : memref<1x8x256xf32, #tpu.memory_space<vmem>>, vector<1x8x256xf32>
    %30 = vector.shape_cast %29 : vector<1x8x256xf32> to vector<8x256xf32>
    %31 = vector.shape_cast %28 : vector<8x256xf32> to vector<1x8x256xf32>
    tpu.vector_store %arg9[%c0_19, %c0_20, %c0_21], %31 {strides = array<i32>} : memref<1x8x256xf32, #tpu.memory_space<vmem>>, vector<1x8x256xf32>,
    return
  }
  func.func @transform_0(%arg0: i32, %arg1: i32) -> (i32, i32, i32) {
    %c0_i32 = arith.constant 0 : i32
    %c0_i32_0 = arith.constant 0 : i32
    return %arg0, %c0_i32, %arg1 : i32, i32, i32
  }
  func.func @transform_1(%arg0: i32, %arg1: i32) -> (i32, i32, i32) {
    %c0_i32 = arith.constant 0 : i32
    %c0_i32_0 = arith.constant 0 : i32
    return %arg0, %c0_i32, %arg1 : i32, i32, i32
  }
  func.func @transform_2(%arg0: i32, %arg1: i32) -> (i32, i32) {
    %c0_i32 = arith.constant 0 : i32
    %c0_i32_0 = arith.constant 0 : i32
    %c0_i32_1 = arith.constant 0 : i32
    return %c0_i32, %c0_i32_0 : i32, i32
  }
  func.func @transform_3(%arg0: i32, %arg1: i32) -> (i32, i32) {
    %c0_i32 = arith.constant 0 : i32
    %c0_i32_0 = arith.constant 0 : i32
    %c0_i32_1 = arith.constant 0 : i32
    return %c0_i32, %c0_i32_0 : i32, i32
  }
  func.func @transform_4(%arg0: i32, %arg1: i32) -> (i32, i32) {
    %c0_i32 = arith.constant 0 : i32
    %c0_i32_0 = arith.constant 0 : i32
    %c0_i32_1 = arith.constant 0 : i32
    return %c0_i32, %c0_i32_0 : i32, i32
  }
  func.func @transform_5(%arg0: i32, %arg1: i32) -> (i32, i32) {
    %c0_i32 = arith.constant 0 : i32
    %c0_i32_0 = arith.constant 0 : i32
    %c0_i32_1 = arith.constant 0 : i32
    return %c0_i32, %c0_i32_0 : i32, i32
  }
  func.func @transform_6(%arg0: i32, %arg1: i32) -> (i32, i32) {
    %c0_i32 = arith.constant 0 : i32
    %c0_i32_0 = arith.constant 0 : i32
    %c0_i32_1 = arith.constant 0 : i32
    return %c0_i32, %c0_i32_0 : i32, i32
  }
  func.func @transform_7(%arg0: i32, %arg1: i32) -> (i32, i32, i32) {
    %c0_i32 = arith.constant 0 : i32
    %c0_i32_0 = arith.constant 0 : i32
    return %arg0, %c0_i32, %arg1 : i32, i32, i32
  }
}

</mosaic_0001>

<bundles_post_ra>
// kernel: tpu_custom_call.1
= control target key start
LH: loop header
LB: loop body
LE: loop exit
PB: predicated region body
PF: predicated region fallthrough
CT: control target
= control target key end

     0   :  { %s1081_s0 = inlined_call_operand.vmem [shape: f32[2,4,256], index: 0, kind: input, shape index: {}]   ;;  %s1082_s1 = inlined_call_operand.vmem [shape: f32[2,8,256], index: 1, kind: input, shape index: {}]   ;;  %s1083_s2 = inlined_call_operand.vmem [shape: f32[16,4], index: 2, kind: input, shape index: {}]   ;;  %s1084_s3 = inlined_call_operand.vmem [shape: f32[16,8], index: 3, kind: input, shape index: {}]   ;;  %s1085_s4 = inlined_call_operand.vmem [shape: f32[16,1], index: 4, kind: input, shape index: {}]   ;;  %s1086_s5 = inlined_call_operand.vmem [shape: f32[16,1], index: 5, kind: input, shape index: {}]   ;;  %s1087_s6 = inlined_call_operand.<no memory space> [shape: f32[1,1], index: 6, kind: input, shape index: {}]   ;;  %s1088_s7 = inlined_call_operand.hbm [shape: f32[2,8,256], index: 7, kind: output, shape index: {}]  }
   0x1   :  { %12 = sst [smem:[#allocation2]] %s1087_s6 }
   0x2   :  { %13 = vsyncpa [#allocation4], 0 }
   0x3   :  { %15 = vsyncpa [#allocation4 + $0x1], 0  ;;  %s932_s26 = smov 0   ;;  %s934_s27 = smov 0  }
   0x4   :  { %s936_s28 = smov 0   ;;  %s938_s29 = smov 0  }
   0x5   :  { %s940_s30 = smov 0   ;;  %s942_s8 = smov 0  }
   0x6 LB: > { %s708_s6 = sadd.s32 4294967295, %s884_s8   ;;  %s709_s9 = sadd.s32 4294967294, %s884_s8   ;;  %s884_s8 = sphi %s942_s8, %s21_s8   ;;  %s880_s30 = sphi %s940_s30, %s1098_s30   ;;  %s876_s29 = sphi %s938_s29, %s1097_s29   ;;  %s872_s28 = sphi %s936_s28, %s1096_s28   ;;  %s868_s27 = sphi %s934_s27, %s1095_s27   ;;  %s864_s26 = sphi %s932_s26, %s1094_s26  }
   0x7   : > { %s33_s10 = sadd.s32 1, %s880_s30  ;;  %s203_s11 = sadd.s32 1, %s872_s28 }
   0x8   : > { %p35_p0 = scmp.ge.s32.totalorder %s33_s10, 2  ;;  %p213_p1 = scmp.ne.s32.totalorder %s872_s28, %s868_s27 }
   0x9   : > { %p214_p2 = scmp.eq.s32.totalorder %s708_s6, 1  ;;  %p219_p3 = scmp.ne.s32.totalorder %s868_s27, %s864_s26 }
   0xa   : > { %s1100_s10 = smov (%p35_p0, %s33_s10), 0  ;;  %p220_p5 = scmp.eq.s32.totalorder %s709_s9, 1 }
   0xb   : > { %1090 = sst [smem:[#allocation6_spill]] %s1100_s10  ;;  %p972_p4 = por %p214_p2, %p213_p1 }
   0xc   : > { %s198_s13 = ssub.s32 %s880_s30, %s1100_s10  ;;  %p712_p6 = scmp.ge.s32.totalorder %s884_s8, 1 }
   0xd   : > { %p201_p7 = scmp.eq.s32.totalorder %s198_s13, 0  ;;  %p979_p8 = por %p220_p5, %p219_p3 }
   0xe   : > { %p279_p9 = scmp.lt.s32.totalorder %s884_s8, 3 }
   0xf   : > { %s985_s15 = scalar_select %p201_p7, %s872_s28, %s203_s11  }
  0x10   : > { %p280_p10 = pnand %p712_p6, %p279_p9 }
  0x11   : > { %p325_p11 = scmp.lt.s32.totalorder (!%p280_p10), %s876_s29, 1  ;;  %v886_v0 = vmov (!%p280_p10), 0.0   ;;  %v527_v1 = vld [vmem:[%s1085_s4] sm:$0xff] (!%p280_p10)  ;;  %v887_v2 = vmov (!%p280_p10), 0   ;;  %v528_v4 = vld [vmem:[%s1085_s4 + $0x8] sm:$0xff] (!%p280_p10)  ;;  %vm445_vm0 = vcmask (!%p280_p10), 1043456  }
  0x12   : > { %283 = sbr.rel (%p280_p10) target bundleno = 318 (0x13e), region = 48  ;;  %423 = vmatprep.mubr.f32.mxu1 (!%p280_p10), %v886_v0  ;;  %514 = vmatprep.mubr.f32.mxu0 (!%p280_p10), %v886_v0  ;;  %v547_v3 = vld [vmem:[%s1086_s5] sm:$0xff] (!%p280_p10)  ;;  %v548_v6 = vld [vmem:[%s1086_s5 + $0x8] sm:$0xff] (!%p280_p10)  ;;  %vm352_vm1 = vcmask (!%p280_p10), 64512   ;;  %vm438_vm2 = vcmask (!%p280_p10), 31744   ;;  %s577_s25 = sld [smem:[#allocation2]] (!%p280_p10) }
  0x13   : > { %795 = vset.pattern.permute.xlu0 (!%p280_p10), %v887_v2  ;;  %796 = vset.pattern.permute.xlu1 (!%p280_p10), %v887_v2  ;;  %v350_v5 = vld [vmem:[%s1084_s3] sm:$0xff] (!%p280_p10)  ;;  %v351_v12 = vld [vmem:[%s1084_s3 + $0x8] sm:$0xff] (!%p280_p10)  ;;  %s321_s6 = sand.u32 (!%p280_p10), 1, %s868_s27   ;;  %s733_s11 = sshll.u32 (!%p280_p10), %s876_s29, 8 }
  0x14   : > { %531 = vperm.xlu0 (!%p280_p10), %795, %v527_v1   ;;  %551 = vperm.xlu1 (!%p280_p10), %796, %v547_v3   ;;  %v348_v11 = vld [vmem:[%s1083_s2] sm:$0xff] (!%p280_p10)  ;;  %v349_v13 = vld [vmem:[%s1083_s2 + $0x8] sm:$0xff] (!%p280_p10)  ;;  %s1034_s20 = scalar_lea.hbm (!%p280_p10), %s1088_s7, %s733_s11  ;;  %s888_s10 = smov (!%p280_p10), [#allocation3]  }
  0x18   : > { %536 = vperm.xlu0 (!%p280_p10), %795, %v528_v4   ;;  %556 = vperm.xlu1 (!%p280_p10), %796, %v548_v6   ;;  %v578_v53 = vstv (!%p280_p10), %s577_s25 }
  0x19   : > { %s326_s18 = scalar_select %p325_p11, %s876_s29, 1 }
  0x1a   : > { %s598_s29 = scalar_lea.sflag [#allocation4], %s321_s6 }
  0x1b   : > { %s732_s21 = sshll.u32 %s326_s18, 4  ;;  %s731_s22 = sshll.u32 %s326_s18, 3 }
  0x1c   : > { %s342_s9 = scalar_lea.vmem %s1082_s1, %s732_s21  ;;  %s332_s16 = scalar_lea.vmem %s1081_s0, %s731_s22 }
  0x1d   : > { %v1010_v7 = vld [vmem:[%s342_s9 + $0x8] sm:$0xff]  ;;  %v1012_v8 = vld [vmem:[%s342_s9] sm:$0xff]  ;;  %s713_s9 = sshll.u32 %s321_s6, 4  ;;  %s810_s21 = sshll.u32 %s888_s10, 4  ;;  %s811_s21 = int_to_ptr.vmem [resolvable:$false] %s810_s21 }
  0x1e   : > { %v345_v9 = vld [vmem:[%s332_s16] sm:$0xff]  ;;  %359 = vmatprep.subr.mxu1 %v1010_v7  ;;  %s323_s13 = scalar_lea.vmem [#allocation3], %s713_s9  ;;  %s812_s22 = scalar_lea.vmem %s811_s21, 512 }
  0x1f   : > { %v437_v10 = vcombine.high %v345_v9, %v345_v9  ;;  %360 = vmatpush1.msra.mxu1 %v1012_v8  ;;  %s614_s16 = sshll.u32 %s323_s13, 4  ;;  %s1036_s16 = int_to_ptr.vmem [resolvable:$true] %s614_s16 }
  0x20   : > { %718 = vmatmul.mubr.msk.f32.vlgmr.msra.gmra.mrb[0].mxu1 %vm352_vm1, %v350_v5  ;;  %s806_s18 = scalar_lea.vmem %s1036_s16, 256  ;;  %p813_p1 = scmp.lt.s32.totalorder %s1036_s16, %s811_s21 }
  0x21   : > { %720 = vmatprep.subr.msk.mxu0 %vm445_vm0, %v437_v10  ;;  %429 = vmatprep.mubr.f32.mxu1 %v886_v0  ;;  %p807_p12 = scmp.ne.s32.totalorder %s1036_s16, %s806_s18  ;;  %p814_p2 = scmp.lt.s32.totalorder %s812_s22, %s806_s18 }
  0x22   : > { %721 = vmatpush1.msk.msra.mxu0 %vm445_vm0, %v345_v9 }
  0x23   : > { %722 = vmatmul.mubr.msk.f32.vlgmr.msra.gmra.mrb[0].mxu0 %vm438_vm2, %v348_v11  ;;  %p808_p13 = pnand %p807_p12, %p972_p4  ;;  %p815_p3 = por %p814_p2, %p813_p1 }
  0x24   : > { %520 = vmatprep.mubr.f32.mxu0 %v886_v0  ;;  %719 = vmatmul.mubr.msk.f32.gmra.mrb[2].mxu1 %vm352_vm1, %v351_v12 }
  0x25   : > { %p809_p0 = pneg %p808_p13 }
  0x27   : > { %723 = vmatmul.mubr.msk.f32.gmra.mrb[2].mxu0 %vm438_vm2, %v349_v13  ;;  %p816_p5 = pnand %p815_p3, %p809_p0 }
  0x93   : > { %v532_v16 = vpop.permute.xlu0 %531  ;;  %v552_v25 = vpop.permute.xlu1 %551 }
  0x97   : > { %v537_v29 = vpop.permute.xlu0 %536  ;;  %v557_v36 = vpop.permute.xlu1 %556 }
  0xf3   : > { %v425_v14 = vpop.f32.mrb[0].mxu1 }
  0xf4   : > { %v427_v15 = vpop.f32.mrb[1].mxu1 }
  0xf6   : > { %v516_v17 = vpop.f32.mrb[0].mxu0 }
  0xf7   : > { %v517_v18 = vadd.f32 %v516_v17, %v425_v14  ;;  %v518_v19 = vpop.f32.mrb[1].mxu0  ;;  %v431_v21 = vpop.f32.mrb[2].mxu1 }
  0xf8   : > { %v519_v20 = vadd.f32 %v518_v19, %v427_v15  ;;  %v433_v23 = vpop.f32.mrb[3].mxu1 }
  0xf9   : > { %v539_v22 = vadd.f32 %v532_v16, %v517_v18 }
  0xfa   : > { %v540_v24 = vadd.f32 %v532_v16, %v519_v20  ;;  %v522_v26 = vpop.f32.mrb[2].mxu0 }
  0xfb   : > { %v523_v27 = vadd.f32 %v522_v26, %v431_v21  ;;  %v524_v28 = vpop.f32.mrb[3].mxu0  ;;  %v543_v31 = vmax.f32 %v539_v22, 0.0 }
  0xfc   : > { %v525_v30 = vadd.f32 %v524_v28, %v433_v23  ;;  %v544_v33 = vmax.f32 %v540_v24, 0.0 }
  0xfd   : > { %v541_v32 = vadd.f32 %v537_v29, %v523_v27  ;;  %v559_v38 = vmul.f32 %v552_v25, %v543_v31 }
  0xfe   : > { %v542_v34 = vadd.f32 %v537_v29, %v525_v30  ;;  %v560_v40 = vmul.f32 %v552_v25, %v544_v33 }
  0xff   : > { %v545_v35 = vmax.f32 %v541_v32, 0.0 }
 0x100   : > { %v546_v37 = vmax.f32 %v542_v34, 0.0 }
 0x101   : > { %v561_v39 = vmul.f32 %v557_v36, %v545_v35 }
 0x102   : > { %v562_v41 = vmul.f32 %v557_v36, %v546_v37 }
 0x103   : > { %v563_v42 = vadd.f32 %v561_v39, %v559_v38 }
 0x104   : > { %v570_v43 = vadd.f32 %v562_v41, %v560_v40 }
 0x105   : > { %v564_v44 = vrot.slane %v563_v42, 4 }
 0x106   : > { %v571_v45 = vrot.slane %v570_v43, 4 }
 0x107   : > { %v565_v46 = vadd.f32 %v564_v44, %v563_v42 }
 0x108   : > { %v572_v47 = vadd.f32 %v571_v45, %v570_v43 }
 0x109   : > { %v566_v48 = vrot.slane %v565_v46, 2 }
 0x10a   : > { %v573_v49 = vrot.slane %v572_v47, 2 }
 0x10b   : > { %v567_v50 = vadd.f32 %v566_v48, %v565_v46 }
 0x10c   : > { %v574_v51 = vadd.f32 %v573_v49, %v572_v47 }
 0x10d   : > { %v568_v52 = vrot.slane %v567_v50, 1 }
 0x10e   : > { %v575_v54 = vrot.slane %v574_v51, 1 }
 0x10f   : > { %v569_v55 = vadd.f32 %v568_v52, %v567_v50 }
 0x110   : > { %v576_v56 = vadd.f32 %v575_v54, %v574_v51 }
 0x111   : > { %v579_v57 = vadd.f32 %v578_v53, %v569_v55 }
 0x112   : > { %v580_v58 = vadd.f32 %v578_v53, %v576_v56 }
 0x113   : > { %v724_v59 = vmul.f32 -1.442695, %v579_v57 }
 0x114   : > { %v725_v60 = vmul.f32 -1.442695, %v580_v58 }
 0x115   : > { %798 = vpow2.f32 %v724_v59 }
 0x116   : > { %800 = vpow2.f32 %v725_v60 }
 0x11f   : > { %v799_v61 = vpop.eup %798 }
 0x120   : > { %v801_v62 = vpop.eup %800  ;;  %v587_v63 = vadd.f32 1.0, %v799_v61 }
 0x121   : > { %v588_v0 = vadd.f32 1.0, %v801_v62 }
 0x122   : > { %802 = vrcp.f32 %v587_v63 }
 0x123   : > { %804 = vrcp.f32 %v588_v0 }
 0x12c   : > { %v803_v1 = vpop.eup %802 }
 0x12d   : > { %v805_v2 = vpop.eup %804  ;;  %v593_v3 = vmul.f32 %v803_v1, %v1012_v8 }
 0x12e   : > { %v594_v4 = vmul.f32 %v805_v2, %v1010_v7 }
 0x12f   : > { %595 = vst [vmem:[%s323_s13] sm:$0xff] %v593_v3 }
 0x130   : > { %596 = vst [vmem:[%s323_s13 + $0x8] sm:$0xff] %v594_v4 }
 0x131   : > { %819 = shalt.err (!%p816_p5)
}
 0x132   : > { %s820_s23 = scalar_lea.hbm %s1034_s20, 256  ;;  %s824_s6 = scalar_lea.hbm %s1088_s7, 512 }
 0x133   : > { %p821_p6 = scmp.ne.s32.totalorder %s1034_s20, %s820_s23  ;;  %p825_p10 = scmp.lt.u32.totalorder %s1034_s20, %s1088_s7 }
 0x134   : > { %p826_p11 = scmp.lt.u32.totalorder %s824_s6, %s820_s23  ;;  %p828_p13 = scmp.lt.u32.totalorder %s820_s23, %s1034_s20 }
 0x135   : > { %p822_p7 = pnand %p821_p6, %p972_p4 }
 0x136   : > { %p827_p12 = por %p826_p11, %p825_p10 }
 0x137   : > { %p823_p9 = pneg %p822_p7 }
 0x138   : > { %p829_p0 = por %p828_p13, %p827_p12 }
 0x13a   : > { %p830_p1 = pnand %p829_p0, %p823_p9 }
 0x13c   : > { %833 = shalt.err (!%p830_p1)
}
 0x13d   : > { %738 = dma.vmem_to_hbm [thread:$0]  (%p972_p4), %s1036_s16, 256, %s1034_s20, %s598_s29  }
 0x13e PF: > { %p744_p2 = scmp.ge.s32.totalorder %s884_s8, 2  ;;  %s626_s13 = sand.u32 1, %s864_s26  }
 0x13f   : > { %s627_s17 = scalar_lea.sflag [#allocation4], %s626_s13 }
 0x140   : > { %p741_p3 = pnand %p744_p2, %p979_p8 }
 0x142   : > { %859 = dma.done.wait (!%p741_p3), %s627_s17, 256  }
 0x143   : > { %861 = vsyncadd (!%p741_p3), %s627_s17, 4294967040  ;;  %s21_s8 = sadd.s32 1, %s884_s8   ;;  %s1093_s12 = sld [smem:[#allocation6_spill]] }
 0x144   : > { %p18_p5 = scmp.ge.s32.totalorder %s21_s8, 4   ;;  %s1094_s26 = smov %s868_s27 }
 0x145   : > { %s1095_s27 = smov %s872_s28  ;;  %s1096_s28 = smov %s985_s15 }
 0x146   : > { %s1097_s29 = smov %s880_s30  ;;  %20 = sbr.rel (!%p18_p5) target bundleno = 6 (0x6), region = 86 }
 0x149   : > { %s1098_s30 = smov %s1093_s12 }
 0x14d   :  { %632 = vsyncpa [#allocation4], 1 }
 0x14e   :  { %634 = vsyncpa [#allocation4 + $0x1], 1 }

</bundles_post_ra>
